<compile_context>
chip_gen: v6e
topology: v6e:2x2x1
jax: 0.10.0
libtpu: 0.0.40
codegen_flags: <defaults>
</compile_context>

<pallas_src>
import jax
import jax.numpy as jnp
from jax import lax
from jax.experimental import pallas as pl
from jax.experimental.pallas import tpu as pltpu


# ------------------------- fused DownConv kernel ---------------------------

def _make_down_conv_kernel(n_stages, has_pool):
    """Fused DownConv: conv1 -> IN -> ReLU -> (residual blocks) -> [pool]."""
    n_in = 2 + 2 * n_stages + (1 if has_pool else 0)

    def kernel(*refs):
        x_ref, gi_ref = refs[0], refs[1]
        w_refs = refs[2:2 + 2 * n_stages]
        pmat_ref = refs[n_in - 1] if has_pool else None
        out_ref = refs[n_in]
        pooled_ref = refs[n_in + 1] if has_pool else None

        x = x_ref[0]                         # (C_in, E) f32
        gi = gi_ref[0]                       # (5, E) int32, -1 = missing nbr
        E = x.shape[-1]

        # In-kernel 1-ring gather: exact one-hot selection matrices (f32 MXU).
        jj = lax.broadcasted_iota(jnp.int32, (E, E), 0)
        onehots = []
        for k in range(5):
            idx = gi[k:k + 1, :]                         # (1, E)
            sel = (jj == idx) & (idx >= 0)               # -1 neighbor -> zeros
            onehots.append(jnp.where(sel, 1.0, 0.0).astype(jnp.float32))

        def mesh_conv(h, w_ref, b_ref):
            # h: (C, E).  Gather the 5 taps, apply the symmetric neighbor
            # functions, then a single K = 5*C MXU matmul with the flattened
            # (C_out, 5*C) weight (instead of five tiny K = C dots).
            t = [jnp.dot(h, m, preferred_element_type=jnp.float32)
                 for m in onehots]
            s = jnp.concatenate(
                [t[0], t[1] + t[3], t[2] + t[4],
                 jnp.abs(t[1] - t[3]), jnp.abs(t[2] - t[4])],
                axis=0)                                   # (5*C, E)
            acc = jnp.dot(w_ref[...].astype(jnp.bfloat16),
                          s.astype(jnp.bfloat16),
                          preferred_element_type=jnp.float32)
            return acc + b_ref[...]

        def inst_norm(h):
            # InstanceNorm2d(affine=False, eps=1e-5), biased variance over E.
            mean = jnp.mean(h, axis=1, keepdims=True)
            cen = h - mean
            var = jnp.mean(cen * cen, axis=1, keepdims=True)
            return cen * lax.rsqrt(var + 1e-5)

        # conv1 -> bn -> relu
        h = jnp.maximum(inst_norm(mesh_conv(x, w_refs[0], w_refs[1])), 0.0)
        # residual conv2 blocks: conv -> bn -> +skip -> relu
        for sidx in range(1, n_stages):
            h2 = inst_norm(mesh_conv(h, w_refs[2 * sidx], w_refs[2 * sidx + 1]))
            h = jnp.maximum(h2 + h, 0.0)

        out_ref[0] = h.astype(out_ref.dtype)
        if has_pool:
            p = pmat_ref[0]                               # (E, E_pool)
            pooled = jnp.dot(h.astype(jnp.bfloat16), p.astype(jnp.bfloat16),
                             preferred_element_type=jnp.float32)
            pooled_ref[0] = pooled.astype(pooled_ref.dtype)

    return kernel


def down_conv(fe, gi, stage_weights, pool_mat=None):
    """One fused DownConv layer.

    fe: (B, C_in, E) features; gi: (B, 5, E) int32 gemm indices (row 0 = self,
    rows 1..4 = 1-ring neighbors, -1 = missing).
    stage_weights: [{'w': (C_out, 5*C_prev), 'b': (C_out, 1)}, ...]
                   (conv1 followed by `blocks` residual convs).
    pool_mat: optional (B, E, E_pool) aggregation matrix standing in for
              MeshPool.  Returns (x2, before_pool) like DownConv.forward.
    """
    B, C_in, E = fe.shape
    C_out = stage_weights[0]["w"].shape[0]
    has_pool = pool_mat is not None

    inputs = [fe, gi]
    in_specs = [
        pl.BlockSpec((1, C_in, E), lambda i: (i, 0, 0)),
        pl.BlockSpec((1, 5, E), lambda i: (i, 0, 0)),
    ]
    for st in stage_weights:
        inputs += [st["w"], st["b"]]
        in_specs += [pl.BlockSpec(st["w"].shape, lambda i: (0, 0)),
                     pl.BlockSpec(st["b"].shape, lambda i: (0, 0))]

    out_spec_full = pl.BlockSpec((1, C_out, E), lambda i: (i, 0, 0))
    if has_pool:
        Ep = pool_mat.shape[2]
        inputs.append(pool_mat)
        in_specs.append(pl.BlockSpec((1, E, Ep), lambda i: (i, 0, 0)))
        out_shape = (jax.ShapeDtypeStruct((B, C_out, E), jnp.float32),
                     jax.ShapeDtypeStruct((B, C_out, Ep), jnp.float32))
        out_specs = (out_spec_full,
                     pl.BlockSpec((1, C_out, Ep), lambda i: (i, 0, 0)))
    else:
        out_shape = jax.ShapeDtypeStruct((B, C_out, E), jnp.float32)
        out_specs = out_spec_full

    outs = pl.pallas_call(
        _make_down_conv_kernel(len(stage_weights), has_pool),
        out_shape=out_shape,
        grid=(B,),
        in_specs=in_specs,
        out_specs=out_specs,
        compiler_params=pltpu.CompilerParams(
            dimension_semantics=("parallel",)),
    )(*inputs)

    if has_pool:
        before_pool, pooled = outs
        return pooled, before_pool
    return outs, None


# ----------------------- fused FC head (Linear+IN1d+ReLU) -------------------

def _make_fc_kernel(n_layers):
    def kernel(*refs):
        x_ref = refs[0]
        w_refs = refs[1:1 + 2 * n_layers]
        o_ref = refs[1 + 2 * n_layers]
        h = x_ref[...]                                   # (B, L0)
        for i in range(n_layers):
            w_t = w_refs[2 * i][...]                     # (L_in, L_out)
            b = w_refs[2 * i + 1][...]                   # (1, L_out)
            h = jnp.dot(h.astype(jnp.bfloat16), w_t.astype(jnp.bfloat16),
                        preferred_element_type=jnp.float32) + b
            # InstanceNorm1d on fe.unsqueeze(1): normalize each row over L.
            mean = jnp.mean(h, axis=1, keepdims=True)
            cen = h - mean
            var = jnp.mean(cen * cen, axis=1, keepdims=True)
            h = cen * lax.rsqrt(var + 1e-5)
            if i < n_layers - 1:
                h = jnp.maximum(h, 0.0)
        o_ref[...] = h.astype(o_ref.dtype)
    return kernel


def fc_stack(x, fc_params):
    B, L0 = x.shape
    inputs = [x]
    in_specs = [pl.BlockSpec((B, L0), lambda i: (0, 0))]
    for p in fc_params:
        inputs += [p["w_t"], p["b"]]
        in_specs += [pl.BlockSpec(p["w_t"].shape, lambda i: (0, 0)),
                     pl.BlockSpec(p["b"].shape, lambda i: (0, 0))]
    L_out = fc_params[-1]["w_t"].shape[1]
    return pl.pallas_call(
        _make_fc_kernel(len(fc_params)),
        out_shape=jax.ShapeDtypeStruct((B, L_out), jnp.float32),
        grid=(1,),
        in_specs=in_specs,
        out_specs=pl.BlockSpec((B, L_out), lambda i: (0, 0)),
    )(*inputs)


# ------------------------------ init / forward ------------------------------

def init_mesh_conv(key, c_in, c_out, k=5):
    # xavier_normal_ on Conv2d weight (c_out, c_in, 1, k); bias = 0.
    fan_in, fan_out = c_in * k, c_out * k
    std = (2.0 / (fan_in + fan_out)) ** 0.5
    w = jax.random.normal(key, (c_out, c_in, k), dtype=jnp.float32) * std
    # flatten so w_flat[co, kk*c_in + c] = w_torch[co, c, 0, kk]
    w_flat = jnp.transpose(w, (0, 2, 1)).reshape(c_out, k * c_in)
    b = jnp.zeros((c_out, 1), dtype=jnp.float32)
    return {"w": w_flat, "b": b}


def init_linear(key, in_f, out_f):
    # reset_params only re-inits Conv2d; Linear keeps PyTorch default init.
    bound = 1.0 / (in_f ** 0.5)
    kw, kb = jax.random.split(key)
    w_t = jax.random.uniform(kw, (in_f, out_f), jnp.float32, -bound, bound)
    b = jax.random.uniform(kb, (1, out_f), jnp.float32, -bound, bound)
    return {"w_t": w_t, "b": b}


def init_mesh_encoder(key, convs, pools, fcs=None, blocks=0, global_pool=None):
    n_layers = len(convs) - 1
    n_keys = n_layers * (blocks + 1) + (len(fcs) if fcs else 0) + 1
    keys = jax.random.split(key, n_keys)
    ki = 0
    down_convs = []
    for i in range(n_layers):
        stages = [init_mesh_conv(keys[ki], convs[i], convs[i + 1])]; ki += 1
        for _ in range(blocks):
            stages.append(init_mesh_conv(keys[ki], convs[i + 1], convs[i + 1]))
            ki += 1
        down_convs.append(stages)
    fcs_params = None
    if fcs is not None:
        last_length = convs[-1]
        if global_pool is None:
            last_length *= pools[-1]
        fcs = list(fcs)
        if fcs and fcs[0] == last_length:
            fcs = fcs[1:]
        fcs_params = []
        for length in fcs:
            fcs_params.append(init_linear(keys[ki], last_length, length))
            ki += 1
            last_length = length
    return {"down_convs": down_convs, "fcs": fcs_params}


def mesh_encoder_forward(params, fe, gi_levels, pool_mats, global_pool=None):
    encoder_outs = []
    for i, stages in enumerate(params["down_convs"]):
        fe, before_pool = down_conv(fe, gi_levels[i], stages, pool_mats[i])
        encoder_outs.append(before_pool)
    if params["fcs"] is not None:
        if global_pool == "max":
            fe = jnp.max(fe, axis=2)
        elif global_pool == "avg":
            fe = jnp.mean(fe, axis=2)
        fe = fe.reshape(fe.shape[0], -1)
        if len(params["fcs"]) > 0:
            fe = fc_stack(fe, params["fcs"])
    return fe, encoder_outs


# ---------------------------------- demo ------------------------------------

if __name__ == "__main__":
    key = jax.random.PRNGKey(0)
    B = 2
    convs = [8, 16, 16]     # channel schedule (multiples of 8: aligned concat)
    pools = [32, 16]        # pools[0] = input edge count, pools[1] = pool target
    fcs = [64, 32]
    blocks = 0

    k_par, k_fe, k_g0, k_g1 = jax.random.split(key, 4)
    params = init_mesh_encoder(k_par, convs, pools, fcs=fcs, blocks=blocks)

    E0, E1 = pools[0], pools[1]
    fe = jax.random.normal(k_fe, (B, convs[0], E0), dtype=jnp.float32)

    def make_gi(k, E):
        # row 0 = edge itself, rows 1..4 = 1-ring neighbors (-1 = missing)
        self_idx = jnp.broadcast_to(
            jnp.arange(E, dtype=jnp.int32)[None, None, :], (B, 1, E))
        nbrs = jax.random.randint(k, (B, 4, E), -1, E, dtype=jnp.int32)
        return jnp.concatenate([self_idx, nbrs], axis=1)

    gi_levels = [make_gi(k_g0, E0), make_gi(k_g1, E1)]

    # TODO(synk): the real MeshPool runs a data-dependent, sequential
    # priority-queue edge collapse that rewrites mesh connectivity (host-side
    # in MeshCNN); here the pooled features are produced by a precomputed
    # (E_in, E_pool) aggregation matrix (each coarse edge averages two fine
    # edges), analogous to the collapsed-feature averaging MeshPool performs.
    rows = jnp.arange(E0)[:, None]
    cols = jnp.arange(E1)[None, :]
    pmat = jnp.where((rows // 2) == cols, 0.5, 0.0).astype(jnp.float32)
    pool_mats = [jnp.broadcast_to(pmat[None], (B, E0, E1)), None]

    out, encoder_outs = mesh_encoder_forward(params, fe, gi_levels, pool_mats)
    out = jax.block_until_ready(out)

    assert out.shape == (B, fcs[-1]), out.shape
    assert encoder_outs[0].shape == (B, convs[1], E0), encoder_outs[0].shape
    assert encoder_outs[1] is None
    assert bool(jnp.all(jnp.isfinite(out)))
    print("KERNEL_OK")
</pallas_src>

<mosaic_0001>
module attributes {stable_mosaic.version = 11 : i64} {
  func.func @kernel(%arg0: i32, %arg1: memref<1x8x32xf32, #tpu.memory_space<vmem>>, %arg2: memref<1x5x32xi32, #tpu.memory_space<vmem>>, %arg3: memref<16x40xf32, #tpu.memory_space<vmem>>, %arg4: memref<16x1xf32, #tpu.memory_space<vmem>>, %arg5: memref<1x32x16xf32, #tpu.memory_space<vmem>>, %arg6: memref<1x16x32xf32, #tpu.memory_space<vmem>>, %arg7: memref<1x16x16xf32, #tpu.memory_space<vmem>>) attributes {dimension_semantics = [#tpu.dimension_semantics<parallel>], iteration_bounds = array<i64: 2>, scalar_prefetch = 0 : i64, scratch_operands = 0 : i64, tpu.core_type = #tpu.core_type<tc>, window_params = [{transform_indices = @transform_0, window_bounds = array<i64: 1, 8, 32>}, {transform_indices = @transform_1, window_bounds = array<i64: 1, 5, 32>}, {pipeline_mode = #tpu.pipeline_mode<synchronous>, transform_indices = @transform_2, window_bounds = array<i64: 16, 40>}, {pipeline_mode = #tpu.pipeline_mode<synchronous>, transform_indices = @transform_3, window_bounds = array<i64: 16, 1>}, {transform_indices = @transform_4, window_bounds = array<i64: 1, 32, 16>}, {transform_indices = @transform_5, window_bounds = array<i64: 1, 16, 32>}, {transform_indices = @transform_6, window_bounds = array<i64: 1, 16, 16>}]} {
    %c0 = arith.constant 0 : index
    %c0_0 = arith.constant 0 : index
    %c0_1 = arith.constant 0 : index
    %0 = vector.load %arg1[%c0, %c0_0, %c0_1] : memref<1x8x32xf32, #tpu.memory_space<vmem>>, vector<1x8x32xf32>
    %1 = vector.shape_cast %0 : vector<1x8x32xf32> to vector<8x32xf32>
    %c0_2 = arith.constant 0 : index
    %c0_3 = arith.constant 0 : index
    %c0_4 = arith.constant 0 : index
    %2 = vector.load %arg2[%c0_2, %c0_3, %c0_4] : memref<1x5x32xi32, #tpu.memory_space<vmem>>, vector<1x5x32xi32>
    %3 = vector.shape_cast %2 : vector<1x5x32xi32> to vector<5x32xi32>
    %4 = tpu.iota {dimensions = array<i32: 0>} : vector<32x32xi32>
    %5 = vector.extract_strided_slice %3 {offsets = [0, 0], sizes = [1, 32], strides = [1, 1]} : vector<5x32xi32> to vector<1x32xi32>
    %6 = vector.broadcast %5 : vector<1x32xi32> to vector<32x32xi32>
    %7 = arith.cmpi eq, %4, %6 : vector<32x32xi32>
    %c0_i32 = arith.constant 0 : i32
    %8 = vector.broadcast %c0_i32 : i32 to vector<1x32xi32>
    %9 = arith.cmpi sge, %5, %8 : vector<1x32xi32>
    %10 = vector.broadcast %9 : vector<1x32xi1> to vector<32x32xi1>
    %11 = arith.andi %7, %10 : vector<32x32xi1>
    %cst = arith.constant 1.000000e+00 : f32
    %cst_5 = arith.constant 0.000000e+00 : f32
    %12 = vector.broadcast %cst : f32 to vector<32x32xf32>
    %13 = vector.broadcast %cst_5 : f32 to vector<32x32xf32>
    %14 = arith.select %11, %12, %13 : vector<32x32xi1>, vector<32x32xf32>
    %15 = vector.extract_strided_slice %3 {offsets = [1, 0], sizes = [1, 32], strides = [1, 1]} : vector<5x32xi32> to vector<1x32xi32>
    %16 = vector.broadcast %15 : vector<1x32xi32> to vector<32x32xi32>
    %17 = arith.cmpi eq, %4, %16 : vector<32x32xi32>
    %c0_i32_6 = arith.constant 0 : i32
    %18 = vector.broadcast %c0_i32_6 : i32 to vector<1x32xi32>
    %19 = arith.cmpi sge, %15, %18 : vector<1x32xi32>
    %20 = vector.broadcast %19 : vector<1x32xi1> to vector<32x32xi1>
    %21 = arith.andi %17, %20 : vector<32x32xi1>
    %cst_7 = arith.constant 1.000000e+00 : f32
    %cst_8 = arith.constant 0.000000e+00 : f32
    %22 = vector.broadcast %cst_7 : f32 to vector<32x32xf32>
    %23 = vector.broadcast %cst_8 : f32 to vector<32x32xf32>
    %24 = arith.select %21, %22, %23 : vector<32x32xi1>, vector<32x32xf32>
    %25 = vector.extract_strided_slice %3 {offsets = [2, 0], sizes = [1, 32], strides = [1, 1]} : vector<5x32xi32> to vector<1x32xi32>
    %26 = vector.broadcast %25 : vector<1x32xi32> to vector<32x32xi32>
    %27 = arith.cmpi eq, %4, %26 : vector<32x32xi32>
    %c0_i32_9 = arith.constant 0 : i32
    %28 = vector.broadcast %c0_i32_9 : i32 to vector<1x32xi32>
    %29 = arith.cmpi sge, %25, %28 : vector<1x32xi32>
    %30 = vector.broadcast %29 : vector<1x32xi1> to vector<32x32xi1>
    %31 = arith.andi %27, %30 : vector<32x32xi1>
    %cst_10 = arith.constant 1.000000e+00 : f32
    %cst_11 = arith.constant 0.000000e+00 : f32
    %32 = vector.broadcast %cst_10 : f32 to vector<32x32xf32>
    %33 = vector.broadcast %cst_11 : f32 to vector<32x32xf32>
    %34 = arith.select %31, %32, %33 : vector<32x32xi1>, vector<32x32xf32>
    %35 = vector.extract_strided_slice %3 {offsets = [3, 0], sizes = [1, 32], strides = [1, 1]} : vector<5x32xi32> to vector<1x32xi32>
    %36 = vector.broadcast %35 : vector<1x32xi32> to vector<32x32xi32>
    %37 = arith.cmpi eq, %4, %36 : vector<32x32xi32>
    %c0_i32_12 = arith.constant 0 : i32
    %38 = vector.broadcast %c0_i32_12 : i32 to vector<1x32xi32>
    %39 = arith.cmpi sge, %35, %38 : vector<1x32xi32>
    %40 = vector.broadcast %39 : vector<1x32xi1> to vector<32x32xi1>
    %41 = arith.andi %37, %40 : vector<32x32xi1>
    %cst_13 = arith.constant 1.000000e+00 : f32
    %cst_14 = arith.constant 0.000000e+00 : f32
    %42 = vector.broadcast %cst_13 : f32 to vector<32x32xf32>
    %43 = vector.broadcast %cst_14 : f32 to vector<32x32xf32>
    %44 = arith.select %41, %42, %43 : vector<32x32xi1>, vector<32x32xf32>
    %45 = vector.extract_strided_slice %3 {offsets = [4, 0], sizes = [1, 32], strides = [1, 1]} : vector<5x32xi32> to vector<1x32xi32>
    %46 = vector.broadcast %45 : vector<1x32xi32> to vector<32x32xi32>
    %47 = arith.cmpi eq, %4, %46 : vector<32x32xi32>
    %c0_i32_15 = arith.constant 0 : i32
    %48 = vector.broadcast %c0_i32_15 : i32 to vector<1x32xi32>
    %49 = arith.cmpi sge, %45, %48 : vector<1x32xi32>
    %50 = vector.broadcast %49 : vector<1x32xi1> to vector<32x32xi1>
    %51 = arith.andi %47, %50 : vector<32x32xi1>
    %cst_16 = arith.constant 1.000000e+00 : f32
    %cst_17 = arith.constant 0.000000e+00 : f32
    %52 = vector.broadcast %cst_16 : f32 to vector<32x32xf32>
    %53 = vector.broadcast %cst_17 : f32 to vector<32x32xf32>
    %54 = arith.select %51, %52, %53 : vector<32x32xi1>, vector<32x32xf32>
    %cst_18 = arith.constant dense<0.000000e+00> : vector<8x32xf32>
    %55 = tpu.matmul %1, %14, %cst_18 {dimension_numbers = #tpu.dot_dimension_numbers<[1], [0], [0], [1], [0, 0, 1, 1], [], []>} : vector<8x32xf32>, vector<32x32xf32>, vector<8x32xf32> -> vector<8x32xf32>
    %cst_19 = arith.constant dense<0.000000e+00> : vector<8x32xf32>
    %56 = tpu.matmul %1, %24, %cst_19 {dimension_numbers = #tpu.dot_dimension_numbers<[1], [0], [0], [1], [0, 0, 1, 1], [], []>} : vector<8x32xf32>, vector<32x32xf32>, vector<8x32xf32> -> vector<8x32xf32>
    %cst_20 = arith.constant dense<0.000000e+00> : vector<8x32xf32>
    %57 = tpu.matmul %1, %34, %cst_20 {dimension_numbers = #tpu.dot_dimension_numbers<[1], [0], [0], [1], [0, 0, 1, 1], [], []>} : vector<8x32xf32>, vector<32x32xf32>, vector<8x32xf32> -> vector<8x32xf32>
    %cst_21 = arith.constant dense<0.000000e+00> : vector<8x32xf32>
    %58 = tpu.matmul %1, %44, %cst_21 {dimension_numbers = #tpu.dot_dimension_numbers<[1], [0], [0], [1], [0, 0, 1, 1], [], []>} : vector<8x32xf32>, vector<32x32xf32>, vector<8x32xf32> -> vector<8x32xf32>
    %cst_22 = arith.constant dense<0.000000e+00> : vector<8x32xf32>
    %59 = tpu.matmul %1, %54, %cst_22 {dimension_numbers = #tpu.dot_dimension_numbers<[1], [0], [0], [1], [0, 0, 1, 1], [], []>} : vector<8x32xf32>, vector<32x32xf32>, vector<8x32xf32> -> vector<8x32xf32>
    %60 = arith.addf %56, %58 : vector<8x32xf32>
    %61 = arith.addf %57, %59 : vector<8x32xf32>
    %62 = arith.subf %56, %58 : vector<8x32xf32>
    %63 = math.absf %62 : vector<8x32xf32>
    %64 = arith.subf %57, %59 : vector<8x32xf32>
    %65 = math.absf %64 : vector<8x32xf32>
    %66 = tpu.concatenate %55, %60, %61, %63, %65 in 0 : vector<8x32xf32>, vector<8x32xf32>, vector<8x32xf32>, vector<8x32xf32>, vector<8x32xf32> -> vector<40x32xf32>
    %c0_23 = arith.constant 0 : index
    %c0_24 = arith.constant 0 : index
    %67 = vector.load %arg3[%c0_23, %c0_24] : memref<16x40xf32, #tpu.memory_space<vmem>>, vector<16x40xf32>
    %68 = arith.truncf %67 : vector<16x40xf32> to vector<16x40xbf16>
    %69 = arith.truncf %66 : vector<40x32xf32> to vector<40x32xbf16>
    %cst_25 = arith.constant dense<0.000000e+00> : vector<16x32xf32>
    %70 = tpu.matmul %68, %69, %cst_25 {dimension_numbers = #tpu.dot_dimension_numbers<[1], [0], [0], [1], [0, 0, 1, 1], [], []>} : vector<16x40xbf16>, vector<40x32xbf16>, vector<16x32xf32> -> vector<16x32xf32>
    %c0_26 = arith.constant 0 : index
    %c0_27 = arith.constant 0 : index
    %71 = vector.load %arg4[%c0_26, %c0_27] : memref<16x1xf32, #tpu.memory_space<vmem>>, vector<16x1xf32>
    %72 = vector.broadcast %71 : vector<16x1xf32> to vector<16x32xf32>
    %73 = arith.addf %70, %72 : vector<16x32xf32>
    %cst_28 = arith.constant dense<0.000000e+00> : vector<16xf32>
    %74 = vector.multi_reduction <add>, %73, %cst_28 [1] : vector<16x32xf32> to vector<16xf32>
    %75 = vector.shape_cast %74 : vector<16xf32> to vector<16x1xf32>
    %cst_29 = arith.constant 3.200000e+01 : f32
    %76 = vector.broadcast %cst_29 : f32 to vector<16x1xf32>
    %77 = arith.divf %75, %76 : vector<16x1xf32>
    %78 = vector.broadcast %77 : vector<16x1xf32> to vector<16x32xf32>
    %79 = arith.subf %73, %78 : vector<16x32xf32>
    %80 = arith.mulf %79, %79 : vector<16x32xf32>
    %cst_30 = arith.constant dense<0.000000e+00> : vector<16xf32>
    %81 = vector.multi_reduction <add>, %80, %cst_30 [1] : vector<16x32xf32> to vector<16xf32>
    %82 = vector.shape_cast %81 : vector<16xf32> to vector<16x1xf32>
    %cst_31 = arith.constant 3.200000e+01 : f32
    %83 = vector.broadcast %cst_31 : f32 to vector<16x1xf32>
    %84 = arith.divf %82, %83 : vector<16x1xf32>
    %cst_32 = arith.constant 9.99999974E-6 : f32
    %85 = vector.broadcast %cst_32 : f32 to vector<16x1xf32>
    %86 = arith.addf %84, %85 : vector<16x1xf32>
    %87 = math.rsqrt %86 : vector<16x1xf32>
    %88 = vector.broadcast %87 : vector<16x1xf32> to vector<16x32xf32>
    %89 = arith.mulf %79, %88 : vector<16x32xf32>
    %cst_33 = arith.constant 0.000000e+00 : f32
    %90 = vector.broadcast %cst_33 : f32 to vector<16x32xf32>
    %91 = arith.maximumf %89, %90 : vector<16x32xf32>
    %c0_34 = arith.constant 0 : index
    %c0_35 = arith.constant 0 : index
    %c0_36 = arith.constant 0 : index
    %92 = vector.load %arg6[%c0_34, %c0_35, %c0_36] : memref<1x16x32xf32, #tpu.memory_space<vmem>>, vector<1x16x32xf32>
    %93 = vector.shape_cast %92 : vector<1x16x32xf32> to vector<16x32xf32>
    %94 = vector.shape_cast %91 : vector<16x32xf32> to vector<1x16x32xf32>
    tpu.vector_store %arg6[%c0_34, %c0_35, %c0_36], %94 {strides = array<i32>} : memref<1x16x32xf32, #tpu.memory_space<vmem>>, vector<1x16x32xf32>,
    %c0_37 = arith.constant 0 : index
    %c0_38 = arith.constant 0 : index
    %c0_39 = arith.constant 0 : index
    %95 = vector.load %arg5[%c0_37, %c0_38, %c0_39] : memref<1x32x16xf32, #tpu.memory_space<vmem>>, vector<1x32x16xf32>
    %96 = vector.shape_cast %95 : vector<1x32x16xf32> to vector<32x16xf32>
    %97 = arith.truncf %91 : vector<16x32xf32> to vector<16x32xbf16>
    %98 = arith.truncf %96 : vector<32x16xf32> to vector<32x16xbf16>
    %cst_40 = arith.constant dense<0.000000e+00> : vector<16x16xf32>
    %99 = tpu.matmul %97, %98, %cst_40 {dimension_numbers = #tpu.dot_dimension_numbers<[1], [0], [0], [1], [0, 0, 1, 1], [], []>} : vector<16x32xbf16>, vector<32x16xbf16>, vector<16x16xf32> -> vector<16x16xf32>
    %c0_41 = arith.constant 0 : index
    %c0_42 = arith.constant 0 : index
    %c0_43 = arith.constant 0 : index
    %100 = vector.load %arg7[%c0_41, %c0_42, %c0_43] : memref<1x16x16xf32, #tpu.memory_space<vmem>>, vector<1x16x16xf32>
    %101 = vector.shape_cast %100 : vector<1x16x16xf32> to vector<16x16xf32>
    %102 = vector.shape_cast %99 : vector<16x16xf32> to vector<1x16x16xf32>
    tpu.vector_store %arg7[%c0_41, %c0_42, %c0_43], %102 {strides = array<i32>} : memref<1x16x16xf32, #tpu.memory_space<vmem>>, vector<1x16x16xf32>,
    return
  }
  func.func @transform_0(%arg0: i32) -> (i32, i32, i32) {
    %c0_i32 = arith.constant 0 : i32
    %c0_i32_0 = arith.constant 0 : i32
    %c0_i32_1 = arith.constant 0 : i32
    return %arg0, %c0_i32, %c0_i32_0 : i32, i32, i32
  }
  func.func @transform_1(%arg0: i32) -> (i32, i32, i32) {
    %c0_i32 = arith.constant 0 : i32
    %c0_i32_0 = arith.constant 0 : i32
    %c0_i32_1 = arith.constant 0 : i32
    return %arg0, %c0_i32, %c0_i32_0 : i32, i32, i32
  }
  func.func @transform_2(%arg0: i32) -> (i32, i32) {
    %c0_i32 = arith.constant 0 : i32
    %c0_i32_0 = arith.constant 0 : i32
    %c0_i32_1 = arith.constant 0 : i32
    return %c0_i32, %c0_i32_0 : i32, i32
  }
  func.func @transform_3(%arg0: i32) -> (i32, i32) {
    %c0_i32 = arith.constant 0 : i32
    %c0_i32_0 = arith.constant 0 : i32
    %c0_i32_1 = arith.constant 0 : i32
    return %c0_i32, %c0_i32_0 : i32, i32
  }
  func.func @transform_4(%arg0: i32) -> (i32, i32, i32) {
    %c0_i32 = arith.constant 0 : i32
    %c0_i32_0 = arith.constant 0 : i32
    %c0_i32_1 = arith.constant 0 : i32
    return %arg0, %c0_i32, %c0_i32_0 : i32, i32, i32
  }
  func.func @transform_5(%arg0: i32) -> (i32, i32, i32) {
    %c0_i32 = arith.constant 0 : i32
    %c0_i32_0 = arith.constant 0 : i32
    %c0_i32_1 = arith.constant 0 : i32
    return %arg0, %c0_i32, %c0_i32_0 : i32, i32, i32
  }
  func.func @transform_6(%arg0: i32) -> (i32, i32, i32) {
    %c0_i32 = arith.constant 0 : i32
    %c0_i32_0 = arith.constant 0 : i32
    %c0_i32_1 = arith.constant 0 : i32
    return %arg0, %c0_i32, %c0_i32_0 : i32, i32, i32
  }
}

</mosaic_0001>

<bundles_post_ra>
// kernel: tpu_custom_call.1
= control target key start
LH: loop header
LB: loop body
LE: loop exit
PB: predicated region body
PF: predicated region fallthrough
CT: control target
= control target key end

     0   :  { %12 = vsyncpa [#allocation3], 0  ;;  %s1746_s0 = inlined_call_operand.vmem [shape: f32[2,8,32], index: 0, kind: input, shape index: {}]   ;;  %s1747_s1 = inlined_call_operand.vmem [shape: s32[2,5,32], index: 1, kind: input, shape index: {}]   ;;  %s1748_s2 = inlined_call_operand.vmem [shape: f32[16,40], index: 2, kind: input, shape index: {}]   ;;  %s1749_s3 = inlined_call_operand.vmem [shape: f32[16,1], index: 3, kind: input, shape index: {}]   ;;  %s1750_s4 = inlined_call_operand.vmem [shape: f32[2,32,16], index: 4, kind: input, shape index: {}]   ;;  %s1751_s5 = inlined_call_operand.hbm [shape: f32[2,16,32], index: 5, kind: output, shape index: {0}]   ;;  %s1752_s6 = inlined_call_operand.hbm [shape: f32[2,16,16], index: 6, kind: output, shape index: {1}]  }
   0x1   :  { %14 = vsyncpa [#allocation3 + $0x1], 0 }
   0x2   :  { %15 = vsyncpa [#allocation5], 0 }
   0x3   :  { %17 = vsyncpa [#allocation5 + $0x1], 0  ;;  %s1418_s21 = smov 0   ;;  %s1420_s22 = smov 0  }
   0x4   :  { %s1422_s23 = smov 0   ;;  %s1424_s24 = smov 0  }
   0x5 LB: > { %s1439_s25 = sadd.s32 4294967295, %s1373_s24   ;;  %s1075_s26 = sadd.s32 4294967294, %s1373_s24   ;;  %s1373_s24 = sphi %s1424_s24, %s1758_s24   ;;  %s1369_s23 = sphi %s1422_s23, %s1757_s23   ;;  %s1365_s22 = sphi %s1420_s22, %s1756_s22   ;;  %s1361_s21 = sphi %s1418_s21, %s1755_s21  }
   0x6   : > { %s1443_s27 = sadd.s32 1, %s1373_s24   ;;  %s150_s28 = sadd.s32 1, %s1369_s23 }
   0x7   : > { %s147_s29 = ssub.s32 %s1373_s24, %s1443_s27  ;;  %p160_p0 = scmp.ne.s32.totalorder %s1369_s23, %s1365_s22 }
   0x8   : > { %p148_p1 = scmp.eq.s32.totalorder %s147_s29, 0  ;;  %p161_p2 = scmp.eq.s32.totalorder %s1439_s25, 1 }
   0x9   : > { %p166_p3 = scmp.ne.s32.totalorder %s1365_s22, %s1361_s21  ;;  %p167_p4 = scmp.eq.s32.totalorder %s1075_s26, 1 }
   0xa   : > { %s1454_s30 = scalar_select %p148_p1, %s1369_s23, %s150_s28  }
   0xb   : > { %p1456_p5 = por %p161_p2, %p160_p0  ;;  %p1460_p6 = por %p167_p4, %p166_p3 }
   0xc   : > { %p1078_p7 = scmp.ge.s32.totalorder %s1373_s24, 1  ;;  %p239_p8 = scmp.lt.s32.totalorder %s1373_s24, 3 }
   0xe   : > { %p240_p9 = pnand %p1078_p7, %p239_p8 }
   0xf   : > { %p282_p10 = scmp.lt.s32.totalorder (!%p240_p9), %s1439_s25, 1  ;;  %s1121_s18 = sshll.u32 (!%p240_p9), %s1439_s25, 8 }
  0x10   : > { %243 = sbr.rel (%p240_p9) target bundleno = 987 (0x3db), region = 40  ;;  %s1666_s26 = scalar_lea.hbm (!%p240_p9), %s1751_s5, %s1121_s18 }
  0x15   : > { %v298_v0 = vlaneseq  ;;  %v1375_v1 = vmov 0.0   ;;  %s1470_s9 = scalar_select %p282_p10, %s1439_s25, 1  ;;  %vm1376_vm0 = vmmov 0   ;;  %v1377_v3 = vmov 0   ;;  %v776_v26 = vld [vmem:[%s1749_s3] sm:$0xff]  ;;  %v777_v27 = vld [vmem:[%s1749_s3 + $0x8] sm:$0xff] }
  0x16   : > { %1155 = vmatprep.subr.mxu0 %v1375_v1  ;;  %1166 = vmatprep.subr.mxu1 %v1375_v1  ;;  %v1378_v17 = vmov 1.0   ;;  %v770_v47 = vld [vmem:[%s1748_s2] sm:$0xff]  ;;  %v771_v48 = vld [vmem:[%s1748_s2 + $0x8] sm:$0xff] }
  0x17   : > { %v1472_v2 = vshrl.u32 %v298_v0, 7  ;;  %1163 = vmatprep.mubr.msk.f32.mxu0 %vm1376_vm0, %v1375_v1  ;;  %1174 = vmatprep.mubr.msk.f32.mxu1 %vm1376_vm0, %v1375_v1  ;;  %s1081_s10 = sshll.u32 %s1470_s9, 3  ;;  %v772_v50 = vpack.c.bf16 %v771_v48, %v770_v47  ;;  %s1120_s11 = sshll.u32 %s1470_s9, 5 }
  0x18   : > { %1278 = vset.pattern.permute.xlu0 %v1377_v3  ;;  %s289_s13 = scalar_lea.vmem %s1747_s1, %s1081_s10  ;;  %s285_s16 = scalar_lea.vmem %s1746_s0, %s1081_s10 }
  0x19   : > { %v305_v4 = vsub.s32 0, %v1472_v2  ;;  %v328_v5 = vsub.s32 1, %v1472_v2  ;;  %v1487_v6 = vadd.s32 24, %v1472_v2  ;;  %v1489_v7 = vld [vmem:[%s289_s13] sm:$0x1f]  ;;  %v1495_v10 = vadd.s32 16, %v1472_v2  ;;  %780 = vperm.xlu0 %1278, %v776_v26   ;;  %s294_s14 = scalar_lea.vmem %s1750_s4, %s1120_s11 }
  0x1a   : > { %vm311_vm1 = vcmp.ge.s32.totalorder %v1489_v7, 0  ;;  %v1500_v12 = vadd.s32 8, %v1472_v2  ;;  %v349_v15 = vsub.s32 2, %v1472_v2  ;;  %v370_v16 = vsub.s32 3, %v1472_v2  ;;  %v1542_v22 = vld [vmem:[%s285_s16] sm:$0xff]  ;;  %s1650_s9 = sand.u32 1, %s1365_s22  }
  0x1b   : > { %v306_v8 = vrot.slane %v1489_v7, %v305_v4  ;;  %v329_v9 = vrot.slane %v1489_v7, %v328_v5  ;;  %v1497_v11 = vsel %vm311_vm1, 1, %v1377_v3  ;;  %v391_v23 = vsub.s32 4, %v1472_v2  ;;  %s1079_s15 = sshll.u32 %s1650_s9, 4  ;;  %s923_s28 = scalar_lea.sflag [#allocation3], %s1650_s9 }
  0x1c   : > { %v316_v13 = vrot.slane %v1497_v11, %v305_v4  ;;  %v337_v14 = vrot.slane %v1497_v11, %v328_v5  ;;  %v350_v18 = vrot.slane %v1489_v7, %v349_v15  ;;  %v358_v19 = vrot.slane %v1497_v11, %v349_v15  ;;  %s274_s16 = scalar_lea.vmem [#allocation2], %s1079_s15  ;;  %s1379_s10 = smov [#allocation2]  }
  0x1d   : > { %vm310_vm2 = vcmp.eq.s32.totalorder %v1487_v6, %v306_v8  ;;  %vm333_vm3 = vcmp.eq.s32.totalorder %v1487_v6, %v329_v9  ;;  %vm309_vm6 = vcmp.eq.s32.totalorder %v1495_v10, %v306_v8  ;;  %vm332_vm8 = vcmp.eq.s32.totalorder %v1495_v10, %v329_v9  ;;  %785 = vperm.xlu0 %1278, %v777_v27   ;;  %s941_s17 = sshll.u32 %s274_s16, 4  ;;  %s1287_s11 = sshll.u32 %s1379_s10, 4  ;;  %s1658_s17 = int_to_ptr.vmem [resolvable:$true] %s941_s17  ;;  %s1288_s11 = int_to_ptr.vmem [resolvable:$false] %s1287_s11 }
  0x1e   : > { %vm317_vm4 = vcmp.eq.s32.totalorder %v316_v13, 1  ;;  %vm338_vm5 = vcmp.eq.s32.totalorder %v337_v14, 1  ;;  %vm308_vm10 = vcmp.eq.s32.totalorder %v1500_v12, %v306_v8  ;;  %vm331_vm12 = vcmp.eq.s32.totalorder %v1500_v12, %v329_v9  ;;  %s1283_s29 = scalar_lea.vmem %s1658_s17, 256  ;;  %s1289_s12 = scalar_lea.vmem %s1288_s11, 512 }
  0x1f   : > { %vm321_vm7 = vmand %vm310_vm2, %vm317_vm4  ;;  %v371_v20 = vrot.slane %v1489_v7, %v370_v16  ;;  %v379_v21 = vrot.slane %v1497_v11, %v370_v16  ;;  %vm307_vm14 = vcmp.eq.s32.totalorder %v1472_v2, %v306_v8  ;;  %vm330_vm1 = vcmp.eq.s32.totalorder %v1472_v2, %v329_v9  ;;  %v870_v8 = vld [vmem:[%s294_s14 + $0x10] sm:$0xff]  ;;  %v871_v9 = vld [vmem:[%s294_s14 + $0x18] sm:$0xff]  ;;  %p1284_p11 = scmp.ne.s32.totalorder %s1658_s17, %s1283_s29  ;;  %p1290_p0 = scmp.lt.s32.totalorder %s1658_s17, %s1288_s11 }
  0x20   : > { %1156 = vmatpush3.msk.msra.mxu0 %vm321_vm7, %v1378_v17  ;;  %vm342_vm9 = vmand %vm333_vm3, %vm338_vm5  ;;  %vm410_vm3 = vcmask 261120   ;;  %vm359_vm7 = vcmp.eq.s32.totalorder %v358_v19, 1  ;;  %v392_v24 = vrot.slane %v1489_v7, %v391_v23  ;;  %v400_v25 = vrot.slane %v1497_v11, %v391_v23  ;;  %p1291_p1 = scmp.lt.s32.totalorder %s1289_s12, %s1283_s29 }
  0x21   : > { %1167 = vmatpush3.msk.msra.mxu1 %vm342_vm9, %v1378_v17  ;;  %1157 = vmatprep.subr.mxu0 %v1375_v1  ;;  %vm320_vm11 = vmand %vm309_vm6, %vm317_vm4  ;;  %vm354_vm6 = vcmp.eq.s32.totalorder %v1487_v6, %v350_v18  ;;  %vm375_vm9 = vcmp.eq.s32.totalorder %v1487_v6, %v371_v20  ;;  %v874_v11 = vpack.c.bf16 %v871_v9, %v870_v8  ;;  %p1285_p12 = pnand %p1284_p11, %p1456_p5 }
  0x22   : > { %1168 = vmatprep.subr.mxu1 %v1375_v1  ;;  %1158 = vmatpush3.msk.msra.mxu0 %vm320_vm11, %v1378_v17  ;;  %vm341_vm13 = vmand %vm332_vm8, %vm338_vm5  ;;  %p1292_p2 = por %p1291_p1, %p1290_p0 }
  0x23   : > { %1169 = vmatpush3.msk.msra.mxu1 %vm341_vm13, %v1378_v17  ;;  %1159 = vmatprep.subr.mxu0 %v1375_v1  ;;  %vm319_vm15 = vmand %vm308_vm10, %vm317_vm4  ;;  %vm380_vm10 = vcmp.eq.s32.totalorder %v379_v21, 1  ;;  %vm374_vm13 = vcmp.eq.s32.totalorder %v1495_v10, %v371_v20  ;;  %p1286_p13 = pneg %p1285_p12 }
  0x24   : > { %1170 = vmatprep.subr.mxu1 %v1375_v1  ;;  %1160 = vmatpush3.msk.msra.mxu0 %vm319_vm15, %v1378_v17  ;;  %vm340_vm2 = vmand %vm331_vm12, %vm338_vm5  ;;  %vm353_vm12 = vcmp.eq.s32.totalorder %v1495_v10, %v350_v18  ;;  %vm352_vm15 = vcmp.eq.s32.totalorder %v1500_v12, %v350_v18 }
  0x25   : > { %1171 = vmatpush3.msk.msra.mxu1 %vm340_vm2, %v1378_v17  ;;  %1161 = vmatprep.subr.mxu0 %v1375_v1  ;;  %vm318_vm8 = vmand %vm307_vm14, %vm317_vm4  ;;  %p1293_p3 = pnand %p1292_p2, %p1286_p13 }
  0x26   : > { %1172 = vmatprep.subr.mxu1 %v1375_v1  ;;  %1162 = vmatpush3.msk.msra.mxu0 %vm318_vm8, %v1378_v17  ;;  %vm339_vm11 = vmand %vm330_vm1, %vm338_vm5  ;;  %vm373_vm1 = vcmp.eq.s32.totalorder %v1500_v12, %v371_v20 }
  0x27   : > { %1173 = vmatpush3.msk.msra.mxu1 %vm339_vm11, %v1378_v17  ;;  %1164 = vmatmul.mubr.msk.f32.vlgmr.msra.gmra.mxu0 %vm410_vm3, %v1542_v22  ;;  %vm363_vm4 = vmand %vm354_vm6, %vm359_vm7  ;;  %vm351_vm6 = vcmp.eq.s32.totalorder %v1472_v2, %v350_v18 }
  0x28   : > { %1177 = vmatprep.subr.mxu0 %v1375_v1  ;;  %1188 = vmatprep.subr.mxu1 %v1375_v1  ;;  %vm384_vm14 = vmand %vm375_vm9, %vm380_vm10  ;;  %vm372_vm9 = vcmp.eq.s32.totalorder %v1472_v2, %v371_v20 }
  0x29   : > { %1175 = vmatmul.mubr.msk.f32.vlgmr.msra.gmra.mxu1 %vm410_vm3, %v1542_v22  ;;  %1178 = vmatpush3.msk.msra.mxu0 %vm363_vm4, %v1378_v17  ;;  %vm362_vm5 = vmand %vm353_vm12, %vm359_vm7  ;;  %vm396_vm4 = vcmp.eq.s32.totalorder %v1487_v6, %v392_v24 }
  0x2a   : > { %1189 = vmatpush3.msk.msra.mxu1 %vm384_vm14, %v1378_v17  ;;  %1179 = vmatprep.subr.mxu0 %v1375_v1  ;;  %vm383_vm2 = vmand %vm374_vm13, %vm380_vm10  ;;  %vm401_vm13 = vcmp.eq.s32.totalorder %v400_v25, 1 }
  0x2b   : > { %1190 = vmatprep.subr.mxu1 %v1375_v1  ;;  %1180 = vmatpush3.msk.msra.mxu0 %vm362_vm5, %v1378_v17  ;;  %vm361_vm8 = vmand %vm352_vm15, %vm359_vm7  ;;  %vm395_vm15 = vcmp.eq.s32.totalorder %v1495_v10, %v392_v24  ;;  %v868_v10 = vld [vmem:[%s294_s14] sm:$0xff] }
  0x2c   : > { %1191 = vmatpush3.msk.msra.mxu1 %vm383_vm2, %v1378_v17  ;;  %1181 = vmatprep.subr.mxu0 %v1375_v1  ;;  %vm382_vm11 = vmand %vm373_vm1, %vm380_vm10  ;;  %vm393_vm1 = vcmp.eq.s32.totalorder %v1472_v2, %v392_v24 }
  0x2d   : > { %1192 = vmatprep.subr.mxu1 %v1375_v1  ;;  %1182 = vmatpush3.msk.msra.mxu0 %vm361_vm8, %v1378_v17  ;;  %vm360_vm12 = vmand %vm351_vm6, %vm359_vm7  ;;  %vm788_vm8 = vcmask 326656  }
  0x2e   : > { %1193 = vmatpush3.msk.msra.mxu1 %vm382_vm11, %v1378_v17  ;;  %1183 = vmatprep.subr.mxu0 %v1375_v1  ;;  %vm381_vm14 = vmand %vm372_vm9, %vm380_vm10  ;;  %vm394_vm10 = vcmp.eq.s32.totalorder %v1500_v12, %v392_v24  ;;  %v869_v12 = vld [vmem:[%s294_s14 + $0x8] sm:$0xff] }
  0x2f   : > { %1194 = vmatprep.subr.mxu1 %v1375_v1  ;;  %1184 = vmatpush3.msk.msra.mxu0 %vm360_vm12, %v1378_v17  ;;  %vm405_vm7 = vmand %vm396_vm4, %vm401_vm13  ;;  %v873_v13 = vpack.c.bf16 %v869_v12, %v868_v10 }
  0x30   : > { %1185 = vmatprep.mubr.msk.f32.mxu0 %vm1376_vm0, %v1375_v1  ;;  %1195 = vmatpush3.msk.msra.mxu1 %vm381_vm14, %v1378_v17  ;;  %vm404_vm5 = vmand %vm395_vm15, %vm401_vm13 }
  0x31   : > { %1196 = vmatprep.mubr.msk.f32.mxu1 %vm1376_vm0, %v1375_v1  ;;  %1186 = vmatmul.mubr.msk.f32.vlgmr.msra.gmra.mxu0 %vm410_vm3, %v1542_v22  ;;  %vm403_vm2 = vmand %vm394_vm10, %vm401_vm13 }
  0x32   : > { %1197 = vmatmul.mubr.msk.f32.vlgmr.msra.gmra.mxu1 %vm410_vm3, %v1542_v22  ;;  %1199 = vmatprep.subr.mxu0 %v1375_v1  ;;  %vm402_vm6 = vmand %vm393_vm1, %vm401_vm13 }
  0x33   : > { %1200 = vmatpush3.msk.msra.mxu0 %vm405_vm7, %v1378_v17  ;;  %1207 = vmatprep.mubr.msk.f32.mxu0 %vm1376_vm0, %v1375_v1 }
  0x34   : > { %1201 = vmatprep.subr.mxu0 %v1375_v1  ;;  %1210 = vmatprep.subr.bf16.mxu1 %v1375_v1 }
  0x35   : > { %1202 = vmatpush3.msk.msra.mxu0 %vm404_vm5, %v1378_v17  ;;  %1216 = vmatprep.mubr.msk.bf16.mxu1 %vm1376_vm0, %v1375_v1 }
  0x36   : > { %1203 = vmatprep.subr.mxu0 %v1375_v1 }
  0x37   : > { %1204 = vmatpush3.msk.msra.mxu0 %vm403_vm2, %v1378_v17 }
  0x38   : > { %1205 = vmatprep.subr.mxu0 %v1375_v1 }
  0x39   : > { %1206 = vmatpush3.msk.msra.mxu0 %vm402_vm6, %v1378_v17 }
  0x3a   : > { %1208 = vmatmul.mubr.msk.f32.vlgmr.msra.gmra.mxu0 %vm410_vm3, %v1542_v22  ;;  %1220 = vmatprep.subr.bf16.mxu0 %v1375_v1 }
  0x3b   : > { %1224 = vmatprep.mubr.msk.bf16.mxu0 %vm1376_vm0, %v1375_v1  ;;  %vm792_vm0 = vcmask 1043456   ;;  %1221 = vmatpush3.bf16.msra.mxu0 %v874_v11 }
  0x3c   : > { %1222 = vmatprep.subr.bf16.mxu0 %v1375_v1 }
  0x3f   : > { %1223 = vmatpush3.bf16.msra.mxu0 %v873_v13 }
  0x94   : > { %v781_v51 = vpop.permute.xlu0 %780 }
  0x98   : > { %v786_v56 = vpop.permute.xlu0 %785 }
  0xe7   : > { %v480_v28 = vpop.f32.mrf.mxu0 }
  0xe9   : > { %v1165_v29 = vpop.f32.mrf.mxu0  ;;  %v550_v30 = vpop.f32.mrf.mxu1 }
  0xeb   : > { %v1176_v31 = vpop.f32.mrf.mxu1 }
  0xf1   : > { %v620_v32 = vpop.f32.mrf.mxu0 }
  0xf2   : > { %v690_v33 = vpop.f32.mrf.mxu1 }
  0xf3   : > { %v1187_v34 = vpop.f32.mrf.mxu0  ;;  %v766_v38 = vsub.f32 %v550_v30, %v690_v33  ;;  %v764_v45 = vadd.f32 %v690_v33, %v550_v30 }
  0xf4   : > { %v1198_v35 = vpop.f32.mrf.mxu1 }
  0xf5   : > { %v767_v42 = vand.u32 2147483647, %v766_v38  ;;  %v773_v49 = vpack.c.bf16 %v764_v45, %v480_v28 }
  0xfa   : > { %v760_v36 = vpop.f32.mrf.mxu0 }
  0xfb   : > { %v768_v37 = vsub.f32 %v620_v32, %v760_v36  ;;  %v765_v43 = vadd.f32 %v760_v36, %v620_v32 }
  0xfc   : > { %v1209_v39 = vpop.f32.mrf.mxu0 }
  0xfd   : > { %v769_v40 = vand.u32 2147483647, %v768_v37  ;;  %v774_v46 = vpack.c.bf16 %v767_v42, %v765_v43 }
  0xff   : > { %v775_v41 = vpack.c.bf16 %v769_v40, %v769_v40 }
 0x101   : > { %v794_v44 = vsel %vm792_vm0, %v775_v41, 0 }
 0x102   : > { %1211 = vmatpush3.bf16.msra.mxu1 %v794_v44 }
 0x103   : > { %1212 = vmatprep.subr.bf16.mxu1 %v1375_v1 }
 0x106   : > { %1213 = vmatpush3.bf16.msra.mxu1 %v774_v46 }
 0x107   : > { %1214 = vmatprep.subr.bf16.mxu1 %v1375_v1 }
 0x10a   : > { %1215 = vmatpush3.bf16.msra.mxu1 %v773_v49 }
 0x10d   : > { %1217 = vmatmul.mubr.msk.bf16.vlgmr.msra.gmra.mxu1 %vm788_vm8, %v772_v50 }
 0x1cd   : > { %v830_v52 = vpop.f32.mrf.mxu1 }
 0x1ce   : > { %v831_v53 = vadd.f32 %v830_v52, %v781_v51 }
 0x1cf   : > { %v1218_v54 = vpop.f32.mrf.mxu1 }
 0x1d0   : > { %v837_v55 = vsel %vm410_vm3, %v831_v53, 0.0 }
 0x1d1   : > { %838 = vadd.xlane.f32.xlu1 %v837_v55  ;;  %v833_v57 = vpop.f32.mrf.mxu1 }
 0x1d2   : > { %v834_v58 = vadd.f32 %v833_v57, %v786_v56 }
 0x1d3   : > { %v1219_v59 = vpop.f32.mrf.mxu1 }
 0x1d4   : > { %v840_v60 = vsel %vm410_vm3, %v834_v58, 0.0 }
 0x1d5   : > { %841 = vadd.xlane.f32.xlu1 %v840_v60 }
 0x25a   : > { %v839_v61 = vpop.xlane.xlu1 %838 }
 0x25b   : > { %v844_v62 = vmul.f32 0.03125, %v839_v61 }
 0x25d   : > { %v846_v63 = vsub.f32 %v831_v53, %v844_v62 }
 0x25e   : > { %v842_v0 = vpop.xlane.xlu1 %841 }
 0x25f   : > { %v845_v2 = vmul.f32 0.03125, %v842_v0  ;;  %v848_v3 = vmul.f32 %v846_v63, %v846_v63 }
 0x261   : > { %v847_v4 = vsub.f32 %v834_v58, %v845_v2  ;;  %v850_v5 = vsel %vm410_vm3, %v848_v3, 0.0 }
 0x262   : > { %851 = vadd.xlane.f32.xlu0 %v850_v5 }
 0x263   : > { %v849_v6 = vmul.f32 %v847_v4, %v847_v4 }
 0x265   : > { %v853_v7 = vsel %vm410_vm3, %v849_v6, 0.0 }
 0x266   : > { %854 = vadd.xlane.f32.xlu1 %v853_v7 }
 0x2eb   : > { %v852_v14 = vpop.xlane.xlu0 %851 }
 0x2ec   : > { %v856_v15 = vmul.f32 0.03125, %v852_v14 }
 0x2ee   : > { %v858_v16 = vadd.f32 1e-05, %v856_v15 }
 0x2ef   : > { %v855_v17 = vpop.xlane.xlu1 %854 }
 0x2f0   : > { %1279 = vrsqrt.f32 %v858_v16  ;;  %v857_v18 = vmul.f32 0.03125, %v855_v17 }
 0x2f2   : > { %v859_v19 = vadd.f32 1e-05, %v857_v18 }
 0x2f4   : > { %1281 = vrsqrt.f32 %v859_v19 }
 0x2fd   : > { %v1280_v20 = vpop.eup %1279 }
 0x2fe   : > { %v862_v21 = vmul.f32 %v1280_v20, %v846_v63 }
 0x300   : > { %v864_v1 = vmax.f32 %v862_v21, 0.0 }
 0x301   : > { %v1282_v22 = vpop.eup %1281 }
 0x302   : > { %v863_v23 = vmul.f32 %v1282_v22, %v847_v4  ;;  %866 = vst.msk [vmem:[%s274_s16] sm:$0xff] %vm410_vm3, %v864_v1 }
 0x304   : > { %v865_v24 = vmax.f32 %v863_v23, 0.0 }
 0x306   : > { %v872_v25 = vpack.c.bf16 %v865_v24, %v864_v1  ;;  %867 = vst.msk [vmem:[%s274_s16 + $0x8] sm:$0xff] %vm410_vm3, %v865_v24 }
 0x308   : > { %1225 = vmatmul.mubr.msk.bf16.vlgmr.msra.gmra.mxu0 %vm410_vm3, %v872_v25 }
 0x309   : > { %1296 = shalt.err (!%p1293_p3)
}
 0x30a   : > { %s1297_s13 = scalar_lea.hbm %s1666_s26, 256  ;;  %s1301_s19 = scalar_lea.hbm %s1751_s5, 512 }
 0x30b   : > { %p1298_p4 = scmp.ne.s32.totalorder %s1666_s26, %s1297_s13  ;;  %p1302_p9 = scmp.lt.s32.totalorder %s1666_s26, %s1751_s5 }
 0x30c   : > { %p1303_p10 = scmp.lt.s32.totalorder %s1301_s19, %s1297_s13 }
 0x30d   : > { %p1299_p7 = pnand %p1298_p4, %p1456_p5 }
 0x30e   : > { %p1304_p11 = por %p1303_p10, %p1302_p9 }
 0x30f   : > { %p1300_p8 = pneg %p1299_p7 }
 0x311   : > { %p1305_p12 = pnand %p1304_p11, %p1300_p8 }
 0x313   : > { %1308 = shalt.err (!%p1305_p12)
}
 0x314   : > { %s1380_s29 = smov 128   ;;  %s1381_s11 = smov 8   ;;  %vm919_vm3 = vcmask 130048  }
 0x315   : > { %1228 = dma.vmem_to_hbm [thread:$0]  (%p1456_p5), %s1658_s17, 256, %s1666_s26, %s923_s28, %s1380_s29, %s1380_s29, %s1381_s11  }
 0x316   : > { %s281_s12 = scalar_lea.vmem [#allocation4], %s1079_s15  ;;  %s1703_s19 = scalar_lea.hbm %s1752_s6, %s1121_s18 }
 0x317   : > { %s957_s13 = sshll.u32 %s281_s12, 4  ;;  %s928_s17 = scalar_lea.sflag [#allocation5], %s1650_s9  ;;  %s1696_s13 = int_to_ptr.vmem [resolvable:$true] %s957_s13 }
 0x318   : > { %s1309_s26 = scalar_lea.vmem %s1696_s13, 256  ;;  %s1382_s15 = smov [#allocation4]  }
 0x319   : > { %p1310_p13 = scmp.ne.s32.totalorder %s1696_s13, %s1309_s26  ;;  %s1313_s28 = sshll.u32 %s1382_s15, 4  ;;  %s1314_s28 = int_to_ptr.vmem [resolvable:$false] %s1313_s28 }
 0x31a   : > { %s1315_s25 = scalar_lea.vmem %s1314_s28, 512  ;;  %p1316_p2 = scmp.lt.s32.totalorder %s1696_s13, %s1314_s28 }
 0x31b   : > { %p1311_p0 = pnand %p1310_p13, %p1456_p5  ;;  %p1317_p3 = scmp.lt.s32.totalorder %s1315_s25, %s1309_s26 }
 0x31d   : > { %p1312_p1 = pneg %p1311_p0  ;;  %p1318_p4 = por %p1317_p3, %p1316_p2 }
 0x31f   : > { %p1319_p7 = pnand %p1318_p4, %p1312_p1 }
 0x3c8   : > { %v912_v26 = vpop.f32.mrf.mxu0 }
 0x3c9   : > { %920 = vst.msk [vmem:[%s281_s12] sm:$0xff] %vm919_vm3, %v912_v26 }
 0x3ca   : > { %v1226_v27 = vpop.f32.mrf.mxu0 }
 0x3cc   : > { %v915_v28 = vpop.f32.mrf.mxu0 }
 0x3cd   : > { %921 = vst.msk [vmem:[%s281_s12 + $0x8] sm:$0xff] %vm919_vm3, %v915_v28 }
 0x3ce   : > { %v1227_v29 = vpop.f32.mrf.mxu0 }
 0x3cf   : > { %1322 = shalt.err (!%p1319_p7)
}
 0x3d0   : > { %s1323_s18 = scalar_lea.hbm %s1703_s19, 256  ;;  %s1327_s10 = scalar_lea.hbm %s1752_s6, 512 }
 0x3d1   : > { %p1324_p8 = scmp.ne.s32.totalorder %s1703_s19, %s1323_s18  ;;  %p1328_p11 = scmp.lt.s32.totalorder %s1703_s19, %s1752_s6 }
 0x3d2   : > { %p1329_p12 = scmp.lt.s32.totalorder %s1327_s10, %s1323_s18 }
 0x3d3   : > { %p1325_p9 = pnand %p1324_p8, %p1456_p5 }
 0x3d4   : > { %p1330_p13 = por %p1329_p12, %p1328_p11 }
 0x3d5   : > { %p1326_p10 = pneg %p1325_p9 }
 0x3d7   : > { %p1331_p0 = pnand %p1330_p13, %p1326_p10 }
 0x3d9   : > { %1334 = shalt.err (!%p1331_p0)
}
 0x3da   : > { %1229 = dma.vmem_to_hbm [thread:$0]  (%p1456_p5), %s1696_s13, 256, %s1703_s19, %s928_s17, %s1380_s29, %s1380_s29, %s1381_s11  }
 0x3db PF: > { %p1239_p1 = scmp.ge.s32.totalorder %s1373_s24, 2  ;;  %s972_s16 = sand.u32 1, %s1361_s21  }
 0x3dc   : > { %s973_s26 = scalar_lea.sflag [#allocation3], %s972_s16 }
 0x3dd   : > { %p1233_p2 = pnand %p1239_p1, %p1460_p6 }
 0x3df   : > { %p1234_p3 = pneg %p1233_p2 }
 0x3e1   : > { %1352 = dma.done.wait (%p1234_p3), %s973_s26, 256  }
 0x3e2   : > { %1354 = vsyncadd (%p1234_p3), %s973_s26, 4294967040  ;;  %s982_s15 = scalar_lea.sflag [#allocation5], %s972_s16 }
 0x3e3   : > { %1356 = dma.done.wait (%p1234_p3), %s982_s15, 256  }
 0x3e4   : > { %1358 = vsyncadd (%p1234_p3), %s982_s15, 4294967040  ;;  %p20_p5 = scmp.ge.s32.totalorder %s1443_s27, 4   ;;  %s1755_s21 = smov %s1365_s22 }
 0x3e5   : > { %s1756_s22 = smov %s1369_s23  ;;  %s1757_s23 = smov %s1454_s30 }
 0x3e6   : > { %s1758_s24 = smov %s1443_s27  ;;  %22 = sbr.rel (!%p20_p5) target bundleno = 5 (0x5), region = 98 }
 0x3eb   :  { %987 = vsyncpa [#allocation3], 1 }
 0x3ec   :  { %989 = vsyncpa [#allocation3 + $0x1], 1 }
 0x3ed   :  { %990 = vsyncpa [#allocation5], 1 }
 0x3ee   :  { %992 = vsyncpa [#allocation5 + $0x1], 1 }

</bundles_post_ra>
